<compile_context>
chip_gen: v6e
topology: v6e:2x2x1
jax: 0.10.0
libtpu: 0.0.40
codegen_flags: <defaults>
</compile_context>

<pallas_src>
import jax
import jax.numpy as jnp
from jax.experimental import pallas as pl
from jax.experimental.pallas import tpu as pltpu

EMBEDDING_DIM = 64
NUM_EXPERTS = 10
EXPERTS_PAD = 128          # lane-aligned expert width for compute (MXU N)
NEG_BIG = -1.0e30          # finite "-inf" for padded expert logits (avoids NaN)


def _round_up(n: int, m: int) -> int:
    return ((n + m - 1) // m) * m


def gating_kernel(x_ref, w_ref, b_ref, o_ref):
    # x_ref: (TB, D)      native dtype (f32 here)
    # w_ref: (D, E_pad)   f32, padded expert columns are zero
    # b_ref: (1, E_pad)   f32, padded expert entries are NEG_BIG
    # o_ref: (TB, E)      f32 softmax probabilities (only real experts stored)
    logits = jnp.dot(x_ref[...], w_ref[...],
                     preferred_element_type=jnp.float32) + b_ref[...]
    # Numerically-stable softmax along the last axis (f32 throughout; padded
    # lanes are ~-1e30 -> exp underflows to exactly 0 and drops out of the sum)
    m = jnp.max(logits, axis=-1, keepdims=True)
    e = jnp.exp(logits - m)
    s = jnp.sum(e, axis=-1, keepdims=True)
    probs = e * pl.reciprocal(s, approx=False)
    # Store only the real expert columns -> narrow HBM writeback.
    o_ref[...] = probs[:, : o_ref.shape[-1]]


def gating_network(x, w, b, *, tb: int = 2048):
    """x: (B, D) float; w: (D, E) f32; b: (E,) f32.
    Returns (B, E) f32 softmax probabilities (matches the PyTorch module)."""
    B, D = x.shape
    E = w.shape[1]
    E_pad = _round_up(max(E, EXPERTS_PAD), 128)

    # Pad experts for compute only: zero weight columns, large-negative bias.
    w_p = jnp.zeros((D, E_pad), dtype=w.dtype).at[:, :E].set(w)
    b_p = jnp.full((1, E_pad), NEG_BIG, dtype=jnp.float32)
    b_p = b_p.at[0, :E].set(b.astype(jnp.float32))

    # Batch tile: sublane-aligned, no wrapper-side padding of x.  The ragged
    # last block (if B % TB != 0) is handled by Pallas; its garbage rows are
    # never written back and never touch valid rows (softmax is row-wise).
    TB = _round_up(min(tb, _round_up(B, 8)), 8)
    grid = (pl.cdiv(B, TB),)

    out = pl.pallas_call(
        gating_kernel,
        out_shape=jax.ShapeDtypeStruct((B, E), jnp.float32),
        grid=grid,
        in_specs=[
            pl.BlockSpec((TB, D), lambda i: (i, 0)),       # x: tiled over batch
            pl.BlockSpec((D, E_pad), lambda i: (0, 0)),    # W: resident
            pl.BlockSpec((1, E_pad), lambda i: (0, 0)),    # b: resident
        ],
        out_specs=pl.BlockSpec((TB, E), lambda i: (i, 0)),  # narrow writeback
        compiler_params=pltpu.CompilerParams(
            dimension_semantics=("parallel",),             # megacore on v7x
            vmem_limit_bytes=32 * 1024 * 1024,
        ),
    )(x, w_p, b_p)

    return out


if __name__ == "__main__":
    key = jax.random.PRNGKey(0)
    kx, kw, kb, kx2 = jax.random.split(key, 4)

    # nn.Linear(embedding_dim, num_experts): weight (E, D) in torch; we store
    # its transpose (D, E). Deterministic uniform init like torch's default.
    bound = 1.0 / (EMBEDDING_DIM ** 0.5)
    w = jax.random.uniform(kw, (EMBEDDING_DIM, NUM_EXPERTS),
                           minval=-bound, maxval=bound, dtype=jnp.float32)
    b = jax.random.uniform(kb, (NUM_EXPERTS,),
                           minval=-bound, maxval=bound, dtype=jnp.float32)

    # Test 1: small batch, single grid step (TB clamps to 8).
    batch = 8
    x = jax.random.normal(kx, (batch, EMBEDDING_DIM), dtype=jnp.float32)
    out = gating_network(x, w, b)
    jax.block_until_ready(out)

    ref = jax.nn.softmax(x.astype(jnp.float32) @ w + b, axis=-1)
    assert out.shape == (batch, NUM_EXPERTS)
    assert jnp.allclose(out, ref, atol=1e-5, rtol=1e-5)
    assert jnp.allclose(jnp.sum(out, axis=-1), 1.0, atol=1e-5)

    # Test 2: multi-step grid with a ragged last block and B not a multiple of
    # 8 or of TB (no wrapper padding anywhere): B=37, tb=16 -> grid=3.
    batch2 = 37
    x2 = jax.random.normal(kx2, (batch2, EMBEDDING_DIM), dtype=jnp.float32)
    out2 = gating_network(x2, w, b, tb=16)
    jax.block_until_ready(out2)
    ref2 = jax.nn.softmax(x2.astype(jnp.float32) @ w + b, axis=-1)
    assert out2.shape == (batch2, NUM_EXPERTS)
    assert jnp.allclose(out2, ref2, atol=1e-5, rtol=1e-5)
    assert jnp.allclose(jnp.sum(out2, axis=-1), 1.0, atol=1e-5)

    print("KERNEL_OK")
</pallas_src>

<mosaic_0001>
module attributes {stable_mosaic.version = 11 : i64} {
  func.func @gating_kernel(%arg0: i32, %arg1: memref<8x64xf32, #tpu.memory_space<vmem>>, %arg2: memref<64x128xf32, #tpu.memory_space<vmem>>, %arg3: memref<1x128xf32, #tpu.memory_space<vmem>>, %arg4: memref<8x10xf32, #tpu.memory_space<vmem>>) attributes {dimension_semantics = [#tpu.dimension_semantics<parallel>], iteration_bounds = array<i64: 1>, scalar_prefetch = 0 : i64, scratch_operands = 0 : i64, tpu.core_type = #tpu.core_type<tc>, window_params = [{transform_indices = @transform_0, window_bounds = array<i64: 8, 64>}, {pipeline_mode = #tpu.pipeline_mode<synchronous>, transform_indices = @transform_1, window_bounds = array<i64: 64, 128>}, {pipeline_mode = #tpu.pipeline_mode<synchronous>, transform_indices = @transform_2, window_bounds = array<i64: 1, 128>}, {transform_indices = @transform_3, window_bounds = array<i64: 8, 10>}]} {
    %c0 = arith.constant 0 : index
    %c0_0 = arith.constant 0 : index
    %0 = vector.load %arg1[%c0, %c0_0] : memref<8x64xf32, #tpu.memory_space<vmem>>, vector<8x64xf32>
    %c0_1 = arith.constant 0 : index
    %c0_2 = arith.constant 0 : index
    %1 = vector.load %arg2[%c0_1, %c0_2] : memref<64x128xf32, #tpu.memory_space<vmem>>, vector<64x128xf32>
    %cst = arith.constant dense<0.000000e+00> : vector<8x128xf32>
    %2 = tpu.matmul %0, %1, %cst {dimension_numbers = #tpu.dot_dimension_numbers<[1], [0], [0], [1], [0, 0, 1, 1], [], []>} : vector<8x64xf32>, vector<64x128xf32>, vector<8x128xf32> -> vector<8x128xf32>
    %c0_3 = arith.constant 0 : index
    %c0_4 = arith.constant 0 : index
    %3 = vector.load %arg3[%c0_3, %c0_4] : memref<1x128xf32, #tpu.memory_space<vmem>>, vector<1x128xf32>
    %4 = vector.broadcast %3 : vector<1x128xf32> to vector<8x128xf32>
    %5 = arith.addf %2, %4 : vector<8x128xf32>
    %cst_5 = arith.constant dense<0xFF800000> : vector<8xf32>
    %6 = vector.multi_reduction <maximumf>, %5, %cst_5 [1] : vector<8x128xf32> to vector<8xf32>
    %7 = vector.shape_cast %6 : vector<8xf32> to vector<8x1xf32>
    %8 = vector.broadcast %7 : vector<8x1xf32> to vector<8x128xf32>
    %9 = arith.subf %5, %8 : vector<8x128xf32>
    %10 = math.exp %9 : vector<8x128xf32>
    %cst_6 = arith.constant dense<0.000000e+00> : vector<8xf32>
    %11 = vector.multi_reduction <add>, %10, %cst_6 [1] : vector<8x128xf32> to vector<8xf32>
    %12 = vector.shape_cast %11 : vector<8xf32> to vector<8x1xf32>
    %13 = tpu.reciprocal %12 : vector<8x1xf32> -> vector<8x1xf32>
    %14 = vector.broadcast %13 : vector<8x1xf32> to vector<8x128xf32>
    %15 = arith.mulf %10, %14 : vector<8x128xf32>
    %16 = vector.extract_strided_slice %15 {offsets = [0, 0], sizes = [8, 10], strides = [1, 1]} : vector<8x128xf32> to vector<8x10xf32>
    %c0_7 = arith.constant 0 : index
    %c0_8 = arith.constant 0 : index
    %17 = vector.load %arg4[%c0_7, %c0_8] : memref<8x10xf32, #tpu.memory_space<vmem>>, vector<8x10xf32>
    tpu.vector_store %arg4[%c0_7, %c0_8], %16 {strides = array<i32>} : memref<8x10xf32, #tpu.memory_space<vmem>>, vector<8x10xf32>,
    return
  }
  func.func @transform_0(%arg0: i32) -> (i32, i32) {
    %c0_i32 = arith.constant 0 : i32
    %c0_i32_0 = arith.constant 0 : i32
    return %arg0, %c0_i32 : i32, i32
  }
  func.func @transform_1(%arg0: i32) -> (i32, i32) {
    %c0_i32 = arith.constant 0 : i32
    %c0_i32_0 = arith.constant 0 : i32
    %c0_i32_1 = arith.constant 0 : i32
    return %c0_i32, %c0_i32_0 : i32, i32
  }
  func.func @transform_2(%arg0: i32) -> (i32, i32) {
    %c0_i32 = arith.constant 0 : i32
    %c0_i32_0 = arith.constant 0 : i32
    %c0_i32_1 = arith.constant 0 : i32
    return %c0_i32, %c0_i32_0 : i32, i32
  }
  func.func @transform_3(%arg0: i32) -> (i32, i32) {
    %c0_i32 = arith.constant 0 : i32
    %c0_i32_0 = arith.constant 0 : i32
    return %arg0, %c0_i32 : i32, i32
  }
}

</mosaic_0001>

<bundles_post_ra>
// kernel: tpu_custom_call.1
= control target key start
LH: loop header
LB: loop body
LE: loop exit
PB: predicated region body
PF: predicated region fallthrough
CT: control target
= control target key end

     0   :  { %8 = vsyncpa [#allocation3], 0  ;;  %s304_s0 = inlined_call_operand.hbm [shape: f32[8,64], index: 0, kind: input, shape index: {}]   ;;  %s305_s1 = inlined_call_operand.hbm [shape: f32[64,128], index: 1, kind: input, shape index: {}]   ;;  %s306_s2 = inlined_call_operand.vmem [shape: f32[1,128], index: 2, kind: input, shape index: {}]   ;;  %s307_s3 = inlined_call_operand.hbm [shape: f32[8,10], index: 3, kind: output, shape index: {}]  }
   0x1   :  { %9 = vsyncpa [#allocation6], 0 }
   0x2   :  { %10 = vsyncpa [#allocation4], 0  ;;  %s265_s12 = smov [#allocation2]   ;;  %s266_s14 = smov [#allocation5]  }
   0x3   :  { %s17_s13 = sshll.u32 %s265_s12, 4  ;;  %s26_s15 = sshll.u32 %s266_s14, 4  ;;  %s18_s13 = int_to_ptr.vmem [resolvable:$true] %s17_s13  ;;  %s27_s15 = int_to_ptr.vmem [resolvable:$true] %s26_s15 }
   0x4   :  { %s207_s16 = scalar_lea.vmem %s18_s13, 128  ;;  %p212_p1 = scmp.lt.s32.totalorder %s18_s13, %s18_s13 }
   0x5   :  { %p208_p0 = scmp.ne.s32.totalorder %s18_s13, %s207_s16  ;;  %p213_p2 = scmp.lt.s32.totalorder %s207_s16, %s207_s16 }
   0x7   :  { %p214_p3 = por %p213_p2, %p212_p1 }
   0x9   :  { %p215_p4 = pnand %p214_p3, %p208_p0 }
   0xb   :  { %218 = shalt.err (!%p215_p4)
}
   0xc   :  { %20 = dma.hbm_to_vmem [thread:$0]  %s304_s0, 128, %s18_s13, [#allocation3]  }
   0xd   :  { %s227_s19 = scalar_lea.vmem %s27_s15, 1024  ;;  %p232_p6 = scmp.lt.s32.totalorder %s27_s15, %s27_s15 }
   0xe   :  { %p228_p5 = scmp.ne.s32.totalorder %s27_s15, %s227_s19  ;;  %p233_p7 = scmp.lt.s32.totalorder %s227_s19, %s227_s19 }
  0x10   :  { %p234_p8 = por %p233_p7, %p232_p6 }
  0x12   :  { %p235_p9 = pnand %p234_p8, %p228_p5 }
  0x14   :  { %238 = shalt.err (!%p235_p9)
}
  0x15   :  { %s267_s20 = smov 128   ;;  %s268_s21 = smov 8  }
  0x16   :  { %32 = dma.hbm_to_vmem [thread:$0]  %s305_s1, 1024, %s27_s15, [#allocation6], %s267_s20, %s267_s20, %s268_s21  }
  0x17   :  { %259 = dma.done.wait [#allocation3], 128  }
  0x18   :  { %260 = vsyncadd [#allocation3], 4294967168 }
  0x19   :  { %261 = dma.done.wait [#allocation6], 1024  }
  0x1a   :  { %262 = vsyncadd [#allocation6], 4294966272  ;;  %v269_v0 = vmov 0.0   ;;  %vm270_vm0 = vmmov 0   ;;  %v49_v1 = vld [vmem:[#allocation5 + $0x38] sm:$0xff]  ;;  %v48_v2 = vld [vmem:[#allocation5 + $0x30] sm:$0xff] }
  0x1b   :  { %169 = vmatprep.subr.mxu0 %v269_v0  ;;  %185 = vmatprep.mubr.msk.f32.mxu0 %vm270_vm0, %v269_v0  ;;  %v47_v3 = vld [vmem:[#allocation5 + $0x28] sm:$0xff]  ;;  %v46_v4 = vld [vmem:[#allocation5 + $0x20] sm:$0xff]  ;;  %v45_v5 = vld [vmem:[#allocation5 + $0x18] sm:$0xff]  ;;  %vm57_vm1 = vcmask 523264   ;;  %s271_s24 = smov [#allocation7]   ;;  %vm140_vm2 = vcmask 80896  }
  0x1c   :  { %170 = vmatpush3.msra.mxu0 %v49_v1  ;;  %v44_v6 = vld [vmem:[#allocation5 + $0x10] sm:$0xff]  ;;  %v43_v7 = vld [vmem:[#allocation5 + $0x8] sm:$0xff]  ;;  %v42_v8 = vld [vmem:[#allocation5] sm:$0xff]  ;;  %s148_s25 = sshll.u32 %s271_s24, 4  ;;  %s149_s25 = int_to_ptr.vmem [resolvable:$true] %s148_s25 }
  0x1d   :  { %171 = vmatprep.subr.mxu0 %v269_v0  ;;  %v41_v9 = vld [vmem:[#allocation2] sm:$0xff]  ;;  %p244_p11 = scmp.lt.s32.totalorder %s149_s25, %s149_s25 }
  0x1e   :  { %172 = vmatpush3.msra.mxu0 %v48_v2  ;;  %v158_v10 = vld [vmem:[%s306_s2] ss:$0 sm:$0xff]  ;;  %s239_s2 = scalar_lea.vmem %s149_s25, 128 }
  0x1f   :  { %173 = vmatprep.subr.mxu0 %v269_v0  ;;  %p240_p10 = scmp.ne.s32.totalorder %s149_s25, %s239_s2  ;;  %p245_p12 = scmp.lt.s32.totalorder %s239_s2, %s239_s2 }
  0x20   :  { %174 = vmatpush3.msra.mxu0 %v47_v3 }
  0x21   :  { %175 = vmatprep.subr.mxu0 %v269_v0  ;;  %p246_p13 = por %p245_p12, %p244_p11 }
  0x22   :  { %176 = vmatpush3.msra.mxu0 %v46_v4 }
  0x23   :  { %177 = vmatprep.subr.mxu0 %v269_v0  ;;  %p247_p0 = pnand %p246_p13, %p240_p10 }
  0x24   :  { %178 = vmatpush3.msra.mxu0 %v45_v5 }
  0x25   :  { %179 = vmatprep.subr.mxu0 %v269_v0 }
  0x26   :  { %180 = vmatpush3.msra.mxu0 %v44_v6 }
  0x27   :  { %181 = vmatprep.subr.mxu0 %v269_v0 }
  0x28   :  { %182 = vmatpush3.msra.mxu0 %v43_v7 }
  0x29   :  { %183 = vmatprep.subr.mxu0 %v269_v0 }
  0x2a   :  { %184 = vmatpush3.msra.mxu0 %v42_v8 }
  0x2b   :  { %186 = vmatmul.mubr.msk.f32.vlgmr.msra.gmra.mxu0 %vm57_vm1, %v41_v9 }
  0xeb   :  { %v127_v11 = vpop.f32.mrf.mxu0 }
  0xec   :  { %v128_v12 = vadd.f32 %v158_v10, %v127_v11 }
  0xed   :  { %v187_v13 = vpop.f32.mrf.mxu0 }
  0xee   :  { %131 = vmax.xlane.f32.xlu0 %v128_v12 }
 0x177   :  { %v132_v14 = vpop.xlane.xlu0 %131 }
 0x178   :  { %v133_v15 = vsub.f32 %v128_v12, %v132_v14 }
 0x17a   :  { %v134_v16 = vmul.f32 1.442695, %v133_v15 }
 0x17c   :  { %195 = vpow2.f32 %v134_v16 }
 0x189   :  { %v196_v17 = vpop.eup %195 }
 0x18a   :  { %136 = vadd.xlane.f32.xlu0 %v196_v17 }
 0x213   :  { %v137_v18 = vpop.xlane.xlu0 %136 }
 0x214   :  { %197 = vrcp.f32 %v137_v18 }
 0x221   :  { %v198_v19 = vpop.eup %197 }
 0x222   :  { %v139_v20 = vmul.f32 %v198_v19, %v196_v17 }
 0x224   :  { %141 = vst.msk [vmem:[#allocation7] sm:$0xff] %vm140_vm2, %v139_v20 }
 0x225   :  { %250 = shalt.err (!%p247_p0)
}
 0x226   :  { %151 = dma.vmem_to_hbm [thread:$0]  %s149_s25, 128, %s307_s3, [#allocation4]  }
 0x227   :  { %263 = dma.done.wait [#allocation4], 128  }
 0x228   :  { %264 = vsyncadd [#allocation4], 4294967168 }
 0x229   :  { %155 = vsyncpa [#allocation3], 1 }
 0x22a   :  { %156 = vsyncpa [#allocation6], 1 }
 0x22b   :  { %157 = vsyncpa [#allocation4], 1 }

</bundles_post_ra>
